<compile_context>
chip_gen: v7x
topology: tpu7x:2x2x1
jax: 0.10.0
libtpu: 0.0.40
codegen_flags: <defaults>
</compile_context>

<pallas_src>
import jax
import jax.numpy as jnp
import numpy as np
from jax.experimental import pallas as pl
from jax.experimental.pallas import tpu as pltpu


def lstm_policy_kernel(x_ref, w_ih_ref, w_hh_ref, b_ref, mu1_ref, mu2_ref):
    """Whole forward pass in a single invocation.

    x_ref   : (B, T, D)  batch-first input (VMEM resident)
    w_ih_ref: (D, 4H)    input->gates weights (pre-transposed)
    w_hh_ref: (H, 4H)    hidden->gates weights (pre-transposed)
    b_ref   : (1, 4H)    combined bias (b_ih + b_hh)
    mu1_ref : (B, T)     sigmoid(h_t[:, 0]) * 5
    mu2_ref : (B, T)     sigmoid(h_t[:, 1]) * 5
    """
    B, T, D = x_ref.shape
    H = w_hh_ref.shape[0]

    w_ih = w_ih_ref[...]                                   # (D, 4H)
    bias = b_ref[...]                                      # (1, 4H)
    # Load W_hh rows once; each (1, 4H) is broadcast on the VPU inside the loop.
    w_hh_rows = [w_hh_ref[j:j + 1, :] for j in range(H)]

    # Hoisted input projection (no serial dependence on h): one small 2-D matmul per
    # batch row, done before the recurrence.  Avoids any in-kernel reshape.
    xw = [jnp.dot(x_ref[b], w_ih, preferred_element_type=jnp.float32) + bias
          for b in range(B)]                               # each (T, 4H)

    h = jnp.zeros((B, H), jnp.float32)
    c = jnp.zeros((B, H), jnp.float32)
    mu1_cols = []
    mu2_cols = []

    # T is tiny and static -> fully unrolled recurrence (no grid / pipeline overhead).
    for t in range(T):
        # Row t of each per-batch projection -> (B, 4H).
        gates = jnp.concatenate([xw[b][t:t + 1, :] for b in range(B)], axis=0)
        # Hidden->gates contribution on the VPU (keep the MXU off the serial path):
        #   gates += sum_j h[:, j] * W_hh_row_j
        for j in range(H):
            gates = gates + h[:, j:j + 1] * w_hh_rows[j]

        # PyTorch gate order: i, f, g, o.
        i = jax.nn.sigmoid(gates[:, 0:H])
        f = jax.nn.sigmoid(gates[:, H:2 * H])
        g = jnp.tanh(gates[:, 2 * H:3 * H])
        o = jax.nn.sigmoid(gates[:, 3 * H:4 * H])

        c = f * c + i * g
        h = o * jnp.tanh(c)

        mu1_cols.append(h[:, 0:1])                         # (B, 1)
        mu2_cols.append(h[:, 1:2])                         # (B, 1)

    # Accumulate along lanes and store each head exactly once, directly as (B, T).
    mu1_ref[...] = jax.nn.sigmoid(jnp.concatenate(mu1_cols, axis=1)) * 5.0
    mu2_ref[...] = jax.nn.sigmoid(jnp.concatenate(mu2_cols, axis=1)) * 5.0


@jax.jit
def policy_network_forward(state, params):
    """state: (B, T, D) float32, batch_first like the PyTorch module."""
    w_ih, w_hh, b_ih, b_hh = params
    B, T, D = state.shape
    H = w_hh.shape[1]

    x = jnp.asarray(state, jnp.float32)                           # (B, T, D), no transpose
    w_ih_t = jnp.asarray(w_ih, jnp.float32).T                     # (D, 4H)
    w_hh_t = jnp.asarray(w_hh, jnp.float32).T                     # (H, 4H)
    b = (jnp.asarray(b_ih, jnp.float32)
         + jnp.asarray(b_hh, jnp.float32)).reshape(1, 4 * H)      # (1, 4H)

    vmem = pl.BlockSpec(memory_space=pltpu.MemorySpace.VMEM)      # full array, VMEM resident
    mu1, mu2 = pl.pallas_call(
        lstm_policy_kernel,
        out_shape=(jax.ShapeDtypeStruct((B, T), jnp.float32),
                   jax.ShapeDtypeStruct((B, T), jnp.float32)),
        in_specs=[vmem, vmem, vmem, vmem],
        out_specs=(vmem, vmem),
    )(x, w_ih_t, w_hh_t, b)
    return mu1, mu2
    # TODO(synk): if T*B*D ever scales up, switch to a time-chunked "arbitrary" grid with
    # h/c carried in VMEM scratch and an explicit vmem_limit_bytes (v7x has 64 MiB VMEM).


def init_params(key, state_dim, hidden_dim):
    """Deterministic init matching PyTorch LSTM param shapes: U(-1/sqrt(H), 1/sqrt(H))."""
    k1, k2, k3, k4 = jax.random.split(key, 4)
    bound = 1.0 / np.sqrt(hidden_dim)
    w_ih = jax.random.uniform(k1, (4 * hidden_dim, state_dim), jnp.float32, -bound, bound)
    w_hh = jax.random.uniform(k2, (4 * hidden_dim, hidden_dim), jnp.float32, -bound, bound)
    b_ih = jax.random.uniform(k3, (4 * hidden_dim,), jnp.float32, -bound, bound)
    b_hh = jax.random.uniform(k4, (4 * hidden_dim,), jnp.float32, -bound, bound)
    return w_ih, w_hh, b_ih, b_hh


def reference_forward(state, params):
    """Pure-JAX reference LSTM (PyTorch semantics) for correctness check."""
    w_ih, w_hh, b_ih, b_hh = params
    B, T, D = state.shape
    H = w_hh.shape[1]
    h = jnp.zeros((B, H), jnp.float32)
    c = jnp.zeros((B, H), jnp.float32)
    outs = []
    for t in range(T):
        gates = state[:, t, :] @ w_ih.T + h @ w_hh.T + b_ih + b_hh
        i = jax.nn.sigmoid(gates[:, 0:H])
        f = jax.nn.sigmoid(gates[:, H:2 * H])
        g = jnp.tanh(gates[:, 2 * H:3 * H])
        o = jax.nn.sigmoid(gates[:, 3 * H:4 * H])
        c = f * c + i * g
        h = o * jnp.tanh(c)
        outs.append(h)
    out = jnp.stack(outs, axis=1)  # (B, T, H)
    return jax.nn.sigmoid(out[:, :, 0]) * 5.0, jax.nn.sigmoid(out[:, :, 1]) * 5.0


if __name__ == "__main__":
    B, T, STATE_DIM, HIDDEN_DIM = 2, 8, 4, 2

    key = jax.random.PRNGKey(0)
    k_param, k_state = jax.random.split(key)
    params = init_params(k_param, STATE_DIM, HIDDEN_DIM)
    state = jax.random.normal(k_state, (B, T, STATE_DIM), jnp.float32)

    mu1, mu2 = policy_network_forward(state, params)
    mu1 = jax.block_until_ready(mu1)
    mu2 = jax.block_until_ready(mu2)

    ref1, ref2 = reference_forward(state, params)
    np.testing.assert_allclose(np.asarray(mu1), np.asarray(ref1), rtol=1e-5, atol=1e-5)
    np.testing.assert_allclose(np.asarray(mu2), np.asarray(ref2), rtol=1e-5, atol=1e-5)

    print("KERNEL_OK")
</pallas_src>

<mosaic_0001>
module attributes {stable_mosaic.version = 11 : i64} {
  func.func @lstm_policy_kernel(%arg0: memref<2x8x4xf32, #tpu.memory_space<vmem>>, %arg1: memref<4x8xf32, #tpu.memory_space<vmem>>, %arg2: memref<2x8xf32, #tpu.memory_space<vmem>>, %arg3: memref<1x8xf32, #tpu.memory_space<vmem>>, %arg4: memref<2x8xf32, #tpu.memory_space<vmem>>, %arg5: memref<2x8xf32, #tpu.memory_space<vmem>>) attributes {dimension_semantics = [], scalar_prefetch = 0 : i64, scratch_operands = 0 : i64, tpu.core_type = #tpu.core_type<tc>} {
    %c0 = arith.constant 0 : index
    %c0_0 = arith.constant 0 : index
    %0 = vector.load %arg1[%c0, %c0_0] : memref<4x8xf32, #tpu.memory_space<vmem>>, vector<4x8xf32>
    %c0_1 = arith.constant 0 : index
    %c0_2 = arith.constant 0 : index
    %1 = vector.load %arg3[%c0_1, %c0_2] : memref<1x8xf32, #tpu.memory_space<vmem>>, vector<1x8xf32>
    %c0_3 = arith.constant 0 : index
    %c0_4 = arith.constant 0 : index
    %2 = vector.load %arg2[%c0_3, %c0_4] : memref<2x8xf32, #tpu.memory_space<vmem>>, vector<1x8xf32>
    %c1 = arith.constant 1 : index
    %c0_5 = arith.constant 0 : index
    %3 = vector.load %arg2[%c1, %c0_5] : memref<2x8xf32, #tpu.memory_space<vmem>>, vector<1x8xf32>
    %c0_6 = arith.constant 0 : index
    %c0_7 = arith.constant 0 : index
    %c0_8 = arith.constant 0 : index
    %4 = vector.load %arg0[%c0_6, %c0_7, %c0_8] : memref<2x8x4xf32, #tpu.memory_space<vmem>>, vector<1x8x4xf32>
    %5 = vector.shape_cast %4 : vector<1x8x4xf32> to vector<8x4xf32>
    %cst = arith.constant dense<0.000000e+00> : vector<8x8xf32>
    %6 = tpu.matmul %5, %0, %cst {dimension_numbers = #tpu.dot_dimension_numbers<[1], [0], [0], [1], [0, 0, 1, 1], [], []>} : vector<8x4xf32>, vector<4x8xf32>, vector<8x8xf32> -> vector<8x8xf32>
    %7 = vector.broadcast %1 : vector<1x8xf32> to vector<8x8xf32>
    %8 = arith.addf %6, %7 : vector<8x8xf32>
    %c1_9 = arith.constant 1 : index
    %c0_10 = arith.constant 0 : index
    %c0_11 = arith.constant 0 : index
    %9 = vector.load %arg0[%c1_9, %c0_10, %c0_11] : memref<2x8x4xf32, #tpu.memory_space<vmem>>, vector<1x8x4xf32>
    %10 = vector.shape_cast %9 : vector<1x8x4xf32> to vector<8x4xf32>
    %cst_12 = arith.constant dense<0.000000e+00> : vector<8x8xf32>
    %11 = tpu.matmul %10, %0, %cst_12 {dimension_numbers = #tpu.dot_dimension_numbers<[1], [0], [0], [1], [0, 0, 1, 1], [], []>} : vector<8x4xf32>, vector<4x8xf32>, vector<8x8xf32> -> vector<8x8xf32>
    %12 = vector.broadcast %1 : vector<1x8xf32> to vector<8x8xf32>
    %13 = arith.addf %11, %12 : vector<8x8xf32>
    %cst_13 = arith.constant 0.000000e+00 : f32
    %14 = vector.broadcast %cst_13 : f32 to vector<2x2xf32>
    %cst_14 = arith.constant 0.000000e+00 : f32
    %15 = vector.broadcast %cst_14 : f32 to vector<2x2xf32>
    %16 = vector.extract_strided_slice %8 {offsets = [0, 0], sizes = [1, 8], strides = [1, 1]} : vector<8x8xf32> to vector<1x8xf32>
    %17 = vector.extract_strided_slice %13 {offsets = [0, 0], sizes = [1, 8], strides = [1, 1]} : vector<8x8xf32> to vector<1x8xf32>
    %18 = tpu.concatenate %16, %17 in 0 : vector<1x8xf32>, vector<1x8xf32> -> vector<2x8xf32>
    %19 = vector.extract_strided_slice %14 {offsets = [0, 0], sizes = [2, 1], strides = [1, 1]} : vector<2x2xf32> to vector<2x1xf32>
    %20 = vector.broadcast %19 : vector<2x1xf32> to vector<2x8xf32>
    %21 = vector.broadcast %2 : vector<1x8xf32> to vector<2x8xf32>
    %22 = arith.mulf %20, %21 : vector<2x8xf32>
    %23 = arith.addf %18, %22 : vector<2x8xf32>
    %24 = vector.extract_strided_slice %14 {offsets = [0, 1], sizes = [2, 1], strides = [1, 1]} : vector<2x2xf32> to vector<2x1xf32>
    %25 = vector.broadcast %24 : vector<2x1xf32> to vector<2x8xf32>
    %26 = vector.broadcast %3 : vector<1x8xf32> to vector<2x8xf32>
    %27 = arith.mulf %25, %26 : vector<2x8xf32>
    %28 = arith.addf %23, %27 : vector<2x8xf32>
    %29 = vector.extract_strided_slice %28 {offsets = [0, 0], sizes = [2, 2], strides = [1, 1]} : vector<2x8xf32> to vector<2x2xf32>
    %30 = arith.negf %29 : vector<2x2xf32>
    %31 = math.exp %30 : vector<2x2xf32>
    %cst_15 = arith.constant 1.000000e+00 : f32
    %32 = vector.broadcast %cst_15 : f32 to vector<2x2xf32>
    %33 = arith.addf %32, %31 : vector<2x2xf32>
    %34 = arith.divf %32, %33 : vector<2x2xf32>
    %35 = vector.extract_strided_slice %28 {offsets = [0, 2], sizes = [2, 2], strides = [1, 1]} : vector<2x8xf32> to vector<2x2xf32>
    %36 = arith.negf %35 : vector<2x2xf32>
    %37 = math.exp %36 : vector<2x2xf32>
    %cst_16 = arith.constant 1.000000e+00 : f32
    %38 = vector.broadcast %cst_16 : f32 to vector<2x2xf32>
    %39 = arith.addf %38, %37 : vector<2x2xf32>
    %40 = arith.divf %38, %39 : vector<2x2xf32>
    %41 = vector.extract_strided_slice %28 {offsets = [0, 4], sizes = [2, 2], strides = [1, 1]} : vector<2x8xf32> to vector<2x2xf32>
    %42 = math.tanh %41 : vector<2x2xf32>
    %43 = vector.extract_strided_slice %28 {offsets = [0, 6], sizes = [2, 2], strides = [1, 1]} : vector<2x8xf32> to vector<2x2xf32>
    %44 = arith.negf %43 : vector<2x2xf32>
    %45 = math.exp %44 : vector<2x2xf32>
    %cst_17 = arith.constant 1.000000e+00 : f32
    %46 = vector.broadcast %cst_17 : f32 to vector<2x2xf32>
    %47 = arith.addf %46, %45 : vector<2x2xf32>
    %48 = arith.divf %46, %47 : vector<2x2xf32>
    %49 = arith.mulf %40, %15 : vector<2x2xf32>
    %50 = arith.mulf %34, %42 : vector<2x2xf32>
    %51 = arith.addf %49, %50 : vector<2x2xf32>
    %52 = math.tanh %51 : vector<2x2xf32>
    %53 = arith.mulf %48, %52 : vector<2x2xf32>
    %54 = vector.extract_strided_slice %53 {offsets = [0, 0], sizes = [2, 1], strides = [1, 1]} : vector<2x2xf32> to vector<2x1xf32>
    %55 = vector.extract_strided_slice %53 {offsets = [0, 1], sizes = [2, 1], strides = [1, 1]} : vector<2x2xf32> to vector<2x1xf32>
    %56 = vector.extract_strided_slice %8 {offsets = [1, 0], sizes = [1, 8], strides = [1, 1]} : vector<8x8xf32> to vector<1x8xf32>
    %57 = vector.extract_strided_slice %13 {offsets = [1, 0], sizes = [1, 8], strides = [1, 1]} : vector<8x8xf32> to vector<1x8xf32>
    %58 = tpu.concatenate %56, %57 in 0 : vector<1x8xf32>, vector<1x8xf32> -> vector<2x8xf32>
    %59 = vector.extract_strided_slice %53 {offsets = [0, 0], sizes = [2, 1], strides = [1, 1]} : vector<2x2xf32> to vector<2x1xf32>
    %60 = vector.broadcast %59 : vector<2x1xf32> to vector<2x8xf32>
    %61 = vector.broadcast %2 : vector<1x8xf32> to vector<2x8xf32>
    %62 = arith.mulf %60, %61 : vector<2x8xf32>
    %63 = arith.addf %58, %62 : vector<2x8xf32>
    %64 = vector.extract_strided_slice %53 {offsets = [0, 1], sizes = [2, 1], strides = [1, 1]} : vector<2x2xf32> to vector<2x1xf32>
    %65 = vector.broadcast %64 : vector<2x1xf32> to vector<2x8xf32>
    %66 = vector.broadcast %3 : vector<1x8xf32> to vector<2x8xf32>
    %67 = arith.mulf %65, %66 : vector<2x8xf32>
    %68 = arith.addf %63, %67 : vector<2x8xf32>
    %69 = vector.extract_strided_slice %68 {offsets = [0, 0], sizes = [2, 2], strides = [1, 1]} : vector<2x8xf32> to vector<2x2xf32>
    %70 = arith.negf %69 : vector<2x2xf32>
    %71 = math.exp %70 : vector<2x2xf32>
    %cst_18 = arith.constant 1.000000e+00 : f32
    %72 = vector.broadcast %cst_18 : f32 to vector<2x2xf32>
    %73 = arith.addf %72, %71 : vector<2x2xf32>
    %74 = arith.divf %72, %73 : vector<2x2xf32>
    %75 = vector.extract_strided_slice %68 {offsets = [0, 2], sizes = [2, 2], strides = [1, 1]} : vector<2x8xf32> to vector<2x2xf32>
    %76 = arith.negf %75 : vector<2x2xf32>
    %77 = math.exp %76 : vector<2x2xf32>
    %cst_19 = arith.constant 1.000000e+00 : f32
    %78 = vector.broadcast %cst_19 : f32 to vector<2x2xf32>
    %79 = arith.addf %78, %77 : vector<2x2xf32>
    %80 = arith.divf %78, %79 : vector<2x2xf32>
    %81 = vector.extract_strided_slice %68 {offsets = [0, 4], sizes = [2, 2], strides = [1, 1]} : vector<2x8xf32> to vector<2x2xf32>
    %82 = math.tanh %81 : vector<2x2xf32>
    %83 = vector.extract_strided_slice %68 {offsets = [0, 6], sizes = [2, 2], strides = [1, 1]} : vector<2x8xf32> to vector<2x2xf32>
    %84 = arith.negf %83 : vector<2x2xf32>
    %85 = math.exp %84 : vector<2x2xf32>
    %cst_20 = arith.constant 1.000000e+00 : f32
    %86 = vector.broadcast %cst_20 : f32 to vector<2x2xf32>
    %87 = arith.addf %86, %85 : vector<2x2xf32>
    %88 = arith.divf %86, %87 : vector<2x2xf32>
    %89 = arith.mulf %80, %51 : vector<2x2xf32>
    %90 = arith.mulf %74, %82 : vector<2x2xf32>
    %91 = arith.addf %89, %90 : vector<2x2xf32>
    %92 = math.tanh %91 : vector<2x2xf32>
    %93 = arith.mulf %88, %92 : vector<2x2xf32>
    %94 = vector.extract_strided_slice %93 {offsets = [0, 0], sizes = [2, 1], strides = [1, 1]} : vector<2x2xf32> to vector<2x1xf32>
    %95 = vector.extract_strided_slice %93 {offsets = [0, 1], sizes = [2, 1], strides = [1, 1]} : vector<2x2xf32> to vector<2x1xf32>
    %96 = vector.extract_strided_slice %8 {offsets = [2, 0], sizes = [1, 8], strides = [1, 1]} : vector<8x8xf32> to vector<1x8xf32>
    %97 = vector.extract_strided_slice %13 {offsets = [2, 0], sizes = [1, 8], strides = [1, 1]} : vector<8x8xf32> to vector<1x8xf32>
    %98 = tpu.concatenate %96, %97 in 0 : vector<1x8xf32>, vector<1x8xf32> -> vector<2x8xf32>
    %99 = vector.extract_strided_slice %93 {offsets = [0, 0], sizes = [2, 1], strides = [1, 1]} : vector<2x2xf32> to vector<2x1xf32>
    %100 = vector.broadcast %99 : vector<2x1xf32> to vector<2x8xf32>
    %101 = vector.broadcast %2 : vector<1x8xf32> to vector<2x8xf32>
    %102 = arith.mulf %100, %101 : vector<2x8xf32>
    %103 = arith.addf %98, %102 : vector<2x8xf32>
    %104 = vector.extract_strided_slice %93 {offsets = [0, 1], sizes = [2, 1], strides = [1, 1]} : vector<2x2xf32> to vector<2x1xf32>
    %105 = vector.broadcast %104 : vector<2x1xf32> to vector<2x8xf32>
    %106 = vector.broadcast %3 : vector<1x8xf32> to vector<2x8xf32>
    %107 = arith.mulf %105, %106 : vector<2x8xf32>
    %108 = arith.addf %103, %107 : vector<2x8xf32>
    %109 = vector.extract_strided_slice %108 {offsets = [0, 0], sizes = [2, 2], strides = [1, 1]} : vector<2x8xf32> to vector<2x2xf32>
    %110 = arith.negf %109 : vector<2x2xf32>
    %111 = math.exp %110 : vector<2x2xf32>
    %cst_21 = arith.constant 1.000000e+00 : f32
    %112 = vector.broadcast %cst_21 : f32 to vector<2x2xf32>
    %113 = arith.addf %112, %111 : vector<2x2xf32>
    %114 = arith.divf %112, %113 : vector<2x2xf32>
    %115 = vector.extract_strided_slice %108 {offsets = [0, 2], sizes = [2, 2], strides = [1, 1]} : vector<2x8xf32> to vector<2x2xf32>
    %116 = arith.negf %115 : vector<2x2xf32>
    %117 = math.exp %116 : vector<2x2xf32>
    %cst_22 = arith.constant 1.000000e+00 : f32
    %118 = vector.broadcast %cst_22 : f32 to vector<2x2xf32>
    %119 = arith.addf %118, %117 : vector<2x2xf32>
    %120 = arith.divf %118, %119 : vector<2x2xf32>
    %121 = vector.extract_strided_slice %108 {offsets = [0, 4], sizes = [2, 2], strides = [1, 1]} : vector<2x8xf32> to vector<2x2xf32>
    %122 = math.tanh %121 : vector<2x2xf32>
    %123 = vector.extract_strided_slice %108 {offsets = [0, 6], sizes = [2, 2], strides = [1, 1]} : vector<2x8xf32> to vector<2x2xf32>
    %124 = arith.negf %123 : vector<2x2xf32>
    %125 = math.exp %124 : vector<2x2xf32>
    %cst_23 = arith.constant 1.000000e+00 : f32
    %126 = vector.broadcast %cst_23 : f32 to vector<2x2xf32>
    %127 = arith.addf %126, %125 : vector<2x2xf32>
    %128 = arith.divf %126, %127 : vector<2x2xf32>
    %129 = arith.mulf %120, %91 : vector<2x2xf32>
    %130 = arith.mulf %114, %122 : vector<2x2xf32>
    %131 = arith.addf %129, %130 : vector<2x2xf32>
    %132 = math.tanh %131 : vector<2x2xf32>
    %133 = arith.mulf %128, %132 : vector<2x2xf32>
    %134 = vector.extract_strided_slice %133 {offsets = [0, 0], sizes = [2, 1], strides = [1, 1]} : vector<2x2xf32> to vector<2x1xf32>
    %135 = vector.extract_strided_slice %133 {offsets = [0, 1], sizes = [2, 1], strides = [1, 1]} : vector<2x2xf32> to vector<2x1xf32>
    %136 = vector.extract_strided_slice %8 {offsets = [3, 0], sizes = [1, 8], strides = [1, 1]} : vector<8x8xf32> to vector<1x8xf32>
    %137 = vector.extract_strided_slice %13 {offsets = [3, 0], sizes = [1, 8], strides = [1, 1]} : vector<8x8xf32> to vector<1x8xf32>
    %138 = tpu.concatenate %136, %137 in 0 : vector<1x8xf32>, vector<1x8xf32> -> vector<2x8xf32>
    %139 = vector.extract_strided_slice %133 {offsets = [0, 0], sizes = [2, 1], strides = [1, 1]} : vector<2x2xf32> to vector<2x1xf32>
    %140 = vector.broadcast %139 : vector<2x1xf32> to vector<2x8xf32>
    %141 = vector.broadcast %2 : vector<1x8xf32> to vector<2x8xf32>
    %142 = arith.mulf %140, %141 : vector<2x8xf32>
    %143 = arith.addf %138, %142 : vector<2x8xf32>
    %144 = vector.extract_strided_slice %133 {offsets = [0, 1], sizes = [2, 1], strides = [1, 1]} : vector<2x2xf32> to vector<2x1xf32>
    %145 = vector.broadcast %144 : vector<2x1xf32> to vector<2x8xf32>
    %146 = vector.broadcast %3 : vector<1x8xf32> to vector<2x8xf32>
    %147 = arith.mulf %145, %146 : vector<2x8xf32>
    %148 = arith.addf %143, %147 : vector<2x8xf32>
    %149 = vector.extract_strided_slice %148 {offsets = [0, 0], sizes = [2, 2], strides = [1, 1]} : vector<2x8xf32> to vector<2x2xf32>
    %150 = arith.negf %149 : vector<2x2xf32>
    %151 = math.exp %150 : vector<2x2xf32>
    %cst_24 = arith.constant 1.000000e+00 : f32
    %152 = vector.broadcast %cst_24 : f32 to vector<2x2xf32>
    %153 = arith.addf %152, %151 : vector<2x2xf32>
    %154 = arith.divf %152, %153 : vector<2x2xf32>
    %155 = vector.extract_strided_slice %148 {offsets = [0, 2], sizes = [2, 2], strides = [1, 1]} : vector<2x8xf32> to vector<2x2xf32>
    %156 = arith.negf %155 : vector<2x2xf32>
    %157 = math.exp %156 : vector<2x2xf32>
    %cst_25 = arith.constant 1.000000e+00 : f32
    %158 = vector.broadcast %cst_25 : f32 to vector<2x2xf32>
    %159 = arith.addf %158, %157 : vector<2x2xf32>
    %160 = arith.divf %158, %159 : vector<2x2xf32>
    %161 = vector.extract_strided_slice %148 {offsets = [0, 4], sizes = [2, 2], strides = [1, 1]} : vector<2x8xf32> to vector<2x2xf32>
    %162 = math.tanh %161 : vector<2x2xf32>
    %163 = vector.extract_strided_slice %148 {offsets = [0, 6], sizes = [2, 2], strides = [1, 1]} : vector<2x8xf32> to vector<2x2xf32>
    %164 = arith.negf %163 : vector<2x2xf32>
    %165 = math.exp %164 : vector<2x2xf32>
    %cst_26 = arith.constant 1.000000e+00 : f32
    %166 = vector.broadcast %cst_26 : f32 to vector<2x2xf32>
    %167 = arith.addf %166, %165 : vector<2x2xf32>
    %168 = arith.divf %166, %167 : vector<2x2xf32>
    %169 = arith.mulf %160, %131 : vector<2x2xf32>
    %170 = arith.mulf %154, %162 : vector<2x2xf32>
    %171 = arith.addf %169, %170 : vector<2x2xf32>
    %172 = math.tanh %171 : vector<2x2xf32>
    %173 = arith.mulf %168, %172 : vector<2x2xf32>
    %174 = vector.extract_strided_slice %173 {offsets = [0, 0], sizes = [2, 1], strides = [1, 1]} : vector<2x2xf32> to vector<2x1xf32>
    %175 = vector.extract_strided_slice %173 {offsets = [0, 1], sizes = [2, 1], strides = [1, 1]} : vector<2x2xf32> to vector<2x1xf32>
    %176 = vector.extract_strided_slice %8 {offsets = [4, 0], sizes = [1, 8], strides = [1, 1]} : vector<8x8xf32> to vector<1x8xf32>
    %177 = vector.extract_strided_slice %13 {offsets = [4, 0], sizes = [1, 8], strides = [1, 1]} : vector<8x8xf32> to vector<1x8xf32>
    %178 = tpu.concatenate %176, %177 in 0 : vector<1x8xf32>, vector<1x8xf32> -> vector<2x8xf32>
    %179 = vector.extract_strided_slice %173 {offsets = [0, 0], sizes = [2, 1], strides = [1, 1]} : vector<2x2xf32> to vector<2x1xf32>
    %180 = vector.broadcast %179 : vector<2x1xf32> to vector<2x8xf32>
    %181 = vector.broadcast %2 : vector<1x8xf32> to vector<2x8xf32>
    %182 = arith.mulf %180, %181 : vector<2x8xf32>
    %183 = arith.addf %178, %182 : vector<2x8xf32>
    %184 = vector.extract_strided_slice %173 {offsets = [0, 1], sizes = [2, 1], strides = [1, 1]} : vector<2x2xf32> to vector<2x1xf32>
    %185 = vector.broadcast %184 : vector<2x1xf32> to vector<2x8xf32>
    %186 = vector.broadcast %3 : vector<1x8xf32> to vector<2x8xf32>
    %187 = arith.mulf %185, %186 : vector<2x8xf32>
    %188 = arith.addf %183, %187 : vector<2x8xf32>
    %189 = vector.extract_strided_slice %188 {offsets = [0, 0], sizes = [2, 2], strides = [1, 1]} : vector<2x8xf32> to vector<2x2xf32>
    %190 = arith.negf %189 : vector<2x2xf32>
    %191 = math.exp %190 : vector<2x2xf32>
    %cst_27 = arith.constant 1.000000e+00 : f32
    %192 = vector.broadcast %cst_27 : f32 to vector<2x2xf32>
    %193 = arith.addf %192, %191 : vector<2x2xf32>
    %194 = arith.divf %192, %193 : vector<2x2xf32>
    %195 = vector.extract_strided_slice %188 {offsets = [0, 2], sizes = [2, 2], strides = [1, 1]} : vector<2x8xf32> to vector<2x2xf32>
    %196 = arith.negf %195 : vector<2x2xf32>
    %197 = math.exp %196 : vector<2x2xf32>
    %cst_28 = arith.constant 1.000000e+00 : f32
    %198 = vector.broadcast %cst_28 : f32 to vector<2x2xf32>
    %199 = arith.addf %198, %197 : vector<2x2xf32>
    %200 = arith.divf %198, %199 : vector<2x2xf32>
    %201 = vector.extract_strided_slice %188 {offsets = [0, 4], sizes = [2, 2], strides = [1, 1]} : vector<2x8xf32> to vector<2x2xf32>
    %202 = math.tanh %201 : vector<2x2xf32>
    %203 = vector.extract_strided_slice %188 {offsets = [0, 6], sizes = [2, 2], strides = [1, 1]} : vector<2x8xf32> to vector<2x2xf32>
    %204 = arith.negf %203 : vector<2x2xf32>
    %205 = math.exp %204 : vector<2x2xf32>
    %cst_29 = arith.constant 1.000000e+00 : f32
    %206 = vector.broadcast %cst_29 : f32 to vector<2x2xf32>
    %207 = arith.addf %206, %205 : vector<2x2xf32>
    %208 = arith.divf %206, %207 : vector<2x2xf32>
    %209 = arith.mulf %200, %171 : vector<2x2xf32>
    %210 = arith.mulf %194, %202 : vector<2x2xf32>
    %211 = arith.addf %209, %210 : vector<2x2xf32>
    %212 = math.tanh %211 : vector<2x2xf32>
    %213 = arith.mulf %208, %212 : vector<2x2xf32>
    %214 = vector.extract_strided_slice %213 {offsets = [0, 0], sizes = [2, 1], strides = [1, 1]} : vector<2x2xf32> to vector<2x1xf32>
    %215 = vector.extract_strided_slice %213 {offsets = [0, 1], sizes = [2, 1], strides = [1, 1]} : vector<2x2xf32> to vector<2x1xf32>
    %216 = vector.extract_strided_slice %8 {offsets = [5, 0], sizes = [1, 8], strides = [1, 1]} : vector<8x8xf32> to vector<1x8xf32>
    %217 = vector.extract_strided_slice %13 {offsets = [5, 0], sizes = [1, 8], strides = [1, 1]} : vector<8x8xf32> to vector<1x8xf32>
    %218 = tpu.concatenate %216, %217 in 0 : vector<1x8xf32>, vector<1x8xf32> -> vector<2x8xf32>
    %219 = vector.extract_strided_slice %213 {offsets = [0, 0], sizes = [2, 1], strides = [1, 1]} : vector<2x2xf32> to vector<2x1xf32>
    %220 = vector.broadcast %219 : vector<2x1xf32> to vector<2x8xf32>
    %221 = vector.broadcast %2 : vector<1x8xf32> to vector<2x8xf32>
    %222 = arith.mulf %220, %221 : vector<2x8xf32>
    %223 = arith.addf %218, %222 : vector<2x8xf32>
    %224 = vector.extract_strided_slice %213 {offsets = [0, 1], sizes = [2, 1], strides = [1, 1]} : vector<2x2xf32> to vector<2x1xf32>
    %225 = vector.broadcast %224 : vector<2x1xf32> to vector<2x8xf32>
    %226 = vector.broadcast %3 : vector<1x8xf32> to vector<2x8xf32>
    %227 = arith.mulf %225, %226 : vector<2x8xf32>
    %228 = arith.addf %223, %227 : vector<2x8xf32>
    %229 = vector.extract_strided_slice %228 {offsets = [0, 0], sizes = [2, 2], strides = [1, 1]} : vector<2x8xf32> to vector<2x2xf32>
    %230 = arith.negf %229 : vector<2x2xf32>
    %231 = math.exp %230 : vector<2x2xf32>
    %cst_30 = arith.constant 1.000000e+00 : f32
    %232 = vector.broadcast %cst_30 : f32 to vector<2x2xf32>
    %233 = arith.addf %232, %231 : vector<2x2xf32>
    %234 = arith.divf %232, %233 : vector<2x2xf32>
    %235 = vector.extract_strided_slice %228 {offsets = [0, 2], sizes = [2, 2], strides = [1, 1]} : vector<2x8xf32> to vector<2x2xf32>
    %236 = arith.negf %235 : vector<2x2xf32>
    %237 = math.exp %236 : vector<2x2xf32>
    %cst_31 = arith.constant 1.000000e+00 : f32
    %238 = vector.broadcast %cst_31 : f32 to vector<2x2xf32>
    %239 = arith.addf %238, %237 : vector<2x2xf32>
    %240 = arith.divf %238, %239 : vector<2x2xf32>
    %241 = vector.extract_strided_slice %228 {offsets = [0, 4], sizes = [2, 2], strides = [1, 1]} : vector<2x8xf32> to vector<2x2xf32>
    %242 = math.tanh %241 : vector<2x2xf32>
    %243 = vector.extract_strided_slice %228 {offsets = [0, 6], sizes = [2, 2], strides = [1, 1]} : vector<2x8xf32> to vector<2x2xf32>
    %244 = arith.negf %243 : vector<2x2xf32>
    %245 = math.exp %244 : vector<2x2xf32>
    %cst_32 = arith.constant 1.000000e+00 : f32
    %246 = vector.broadcast %cst_32 : f32 to vector<2x2xf32>
    %247 = arith.addf %246, %245 : vector<2x2xf32>
    %248 = arith.divf %246, %247 : vector<2x2xf32>
    %249 = arith.mulf %240, %211 : vector<2x2xf32>
    %250 = arith.mulf %234, %242 : vector<2x2xf32>
    %251 = arith.addf %249, %250 : vector<2x2xf32>
    %252 = math.tanh %251 : vector<2x2xf32>
    %253 = arith.mulf %248, %252 : vector<2x2xf32>
    %254 = vector.extract_strided_slice %253 {offsets = [0, 0], sizes = [2, 1], strides = [1, 1]} : vector<2x2xf32> to vector<2x1xf32>
    %255 = vector.extract_strided_slice %253 {offsets = [0, 1], sizes = [2, 1], strides = [1, 1]} : vector<2x2xf32> to vector<2x1xf32>
    %256 = vector.extract_strided_slice %8 {offsets = [6, 0], sizes = [1, 8], strides = [1, 1]} : vector<8x8xf32> to vector<1x8xf32>
    %257 = vector.extract_strided_slice %13 {offsets = [6, 0], sizes = [1, 8], strides = [1, 1]} : vector<8x8xf32> to vector<1x8xf32>
    %258 = tpu.concatenate %256, %257 in 0 : vector<1x8xf32>, vector<1x8xf32> -> vector<2x8xf32>
    %259 = vector.extract_strided_slice %253 {offsets = [0, 0], sizes = [2, 1], strides = [1, 1]} : vector<2x2xf32> to vector<2x1xf32>
    %260 = vector.broadcast %259 : vector<2x1xf32> to vector<2x8xf32>
    %261 = vector.broadcast %2 : vector<1x8xf32> to vector<2x8xf32>
    %262 = arith.mulf %260, %261 : vector<2x8xf32>
    %263 = arith.addf %258, %262 : vector<2x8xf32>
    %264 = vector.extract_strided_slice %253 {offsets = [0, 1], sizes = [2, 1], strides = [1, 1]} : vector<2x2xf32> to vector<2x1xf32>
    %265 = vector.broadcast %264 : vector<2x1xf32> to vector<2x8xf32>
    %266 = vector.broadcast %3 : vector<1x8xf32> to vector<2x8xf32>
    %267 = arith.mulf %265, %266 : vector<2x8xf32>
    %268 = arith.addf %263, %267 : vector<2x8xf32>
    %269 = vector.extract_strided_slice %268 {offsets = [0, 0], sizes = [2, 2], strides = [1, 1]} : vector<2x8xf32> to vector<2x2xf32>
    %270 = arith.negf %269 : vector<2x2xf32>
    %271 = math.exp %270 : vector<2x2xf32>
    %cst_33 = arith.constant 1.000000e+00 : f32
    %272 = vector.broadcast %cst_33 : f32 to vector<2x2xf32>
    %273 = arith.addf %272, %271 : vector<2x2xf32>
    %274 = arith.divf %272, %273 : vector<2x2xf32>
    %275 = vector.extract_strided_slice %268 {offsets = [0, 2], sizes = [2, 2], strides = [1, 1]} : vector<2x8xf32> to vector<2x2xf32>
    %276 = arith.negf %275 : vector<2x2xf32>
    %277 = math.exp %276 : vector<2x2xf32>
    %cst_34 = arith.constant 1.000000e+00 : f32
    %278 = vector.broadcast %cst_34 : f32 to vector<2x2xf32>
    %279 = arith.addf %278, %277 : vector<2x2xf32>
    %280 = arith.divf %278, %279 : vector<2x2xf32>
    %281 = vector.extract_strided_slice %268 {offsets = [0, 4], sizes = [2, 2], strides = [1, 1]} : vector<2x8xf32> to vector<2x2xf32>
    %282 = math.tanh %281 : vector<2x2xf32>
    %283 = vector.extract_strided_slice %268 {offsets = [0, 6], sizes = [2, 2], strides = [1, 1]} : vector<2x8xf32> to vector<2x2xf32>
    %284 = arith.negf %283 : vector<2x2xf32>
    %285 = math.exp %284 : vector<2x2xf32>
    %cst_35 = arith.constant 1.000000e+00 : f32
    %286 = vector.broadcast %cst_35 : f32 to vector<2x2xf32>
    %287 = arith.addf %286, %285 : vector<2x2xf32>
    %288 = arith.divf %286, %287 : vector<2x2xf32>
    %289 = arith.mulf %280, %251 : vector<2x2xf32>
    %290 = arith.mulf %274, %282 : vector<2x2xf32>
    %291 = arith.addf %289, %290 : vector<2x2xf32>
    %292 = math.tanh %291 : vector<2x2xf32>
    %293 = arith.mulf %288, %292 : vector<2x2xf32>
    %294 = vector.extract_strided_slice %293 {offsets = [0, 0], sizes = [2, 1], strides = [1, 1]} : vector<2x2xf32> to vector<2x1xf32>
    %295 = vector.extract_strided_slice %293 {offsets = [0, 1], sizes = [2, 1], strides = [1, 1]} : vector<2x2xf32> to vector<2x1xf32>
    %296 = vector.extract_strided_slice %8 {offsets = [7, 0], sizes = [1, 8], strides = [1, 1]} : vector<8x8xf32> to vector<1x8xf32>
    %297 = vector.extract_strided_slice %13 {offsets = [7, 0], sizes = [1, 8], strides = [1, 1]} : vector<8x8xf32> to vector<1x8xf32>
    %298 = tpu.concatenate %296, %297 in 0 : vector<1x8xf32>, vector<1x8xf32> -> vector<2x8xf32>
    %299 = vector.extract_strided_slice %293 {offsets = [0, 0], sizes = [2, 1], strides = [1, 1]} : vector<2x2xf32> to vector<2x1xf32>
    %300 = vector.broadcast %299 : vector<2x1xf32> to vector<2x8xf32>
    %301 = vector.broadcast %2 : vector<1x8xf32> to vector<2x8xf32>
    %302 = arith.mulf %300, %301 : vector<2x8xf32>
    %303 = arith.addf %298, %302 : vector<2x8xf32>
    %304 = vector.extract_strided_slice %293 {offsets = [0, 1], sizes = [2, 1], strides = [1, 1]} : vector<2x2xf32> to vector<2x1xf32>
    %305 = vector.broadcast %304 : vector<2x1xf32> to vector<2x8xf32>
    %306 = vector.broadcast %3 : vector<1x8xf32> to vector<2x8xf32>
    %307 = arith.mulf %305, %306 : vector<2x8xf32>
    %308 = arith.addf %303, %307 : vector<2x8xf32>
    %309 = vector.extract_strided_slice %308 {offsets = [0, 0], sizes = [2, 2], strides = [1, 1]} : vector<2x8xf32> to vector<2x2xf32>
    %310 = arith.negf %309 : vector<2x2xf32>
    %311 = math.exp %310 : vector<2x2xf32>
    %cst_36 = arith.constant 1.000000e+00 : f32
    %312 = vector.broadcast %cst_36 : f32 to vector<2x2xf32>
    %313 = arith.addf %312, %311 : vector<2x2xf32>
    %314 = arith.divf %312, %313 : vector<2x2xf32>
    %315 = vector.extract_strided_slice %308 {offsets = [0, 2], sizes = [2, 2], strides = [1, 1]} : vector<2x8xf32> to vector<2x2xf32>
    %316 = arith.negf %315 : vector<2x2xf32>
    %317 = math.exp %316 : vector<2x2xf32>
    %cst_37 = arith.constant 1.000000e+00 : f32
    %318 = vector.broadcast %cst_37 : f32 to vector<2x2xf32>
    %319 = arith.addf %318, %317 : vector<2x2xf32>
    %320 = arith.divf %318, %319 : vector<2x2xf32>
    %321 = vector.extract_strided_slice %308 {offsets = [0, 4], sizes = [2, 2], strides = [1, 1]} : vector<2x8xf32> to vector<2x2xf32>
    %322 = math.tanh %321 : vector<2x2xf32>
    %323 = vector.extract_strided_slice %308 {offsets = [0, 6], sizes = [2, 2], strides = [1, 1]} : vector<2x8xf32> to vector<2x2xf32>
    %324 = arith.negf %323 : vector<2x2xf32>
    %325 = math.exp %324 : vector<2x2xf32>
    %cst_38 = arith.constant 1.000000e+00 : f32
    %326 = vector.broadcast %cst_38 : f32 to vector<2x2xf32>
    %327 = arith.addf %326, %325 : vector<2x2xf32>
    %328 = arith.divf %326, %327 : vector<2x2xf32>
    %329 = arith.mulf %320, %291 : vector<2x2xf32>
    %330 = arith.mulf %314, %322 : vector<2x2xf32>
    %331 = arith.addf %329, %330 : vector<2x2xf32>
    %332 = math.tanh %331 : vector<2x2xf32>
    %333 = arith.mulf %328, %332 : vector<2x2xf32>
    %334 = vector.extract_strided_slice %333 {offsets = [0, 0], sizes = [2, 1], strides = [1, 1]} : vector<2x2xf32> to vector<2x1xf32>
    %335 = vector.extract_strided_slice %333 {offsets = [0, 1], sizes = [2, 1], strides = [1, 1]} : vector<2x2xf32> to vector<2x1xf32>
    %336 = tpu.concatenate %54, %94, %134, %174, %214, %254, %294, %334 in 1 : vector<2x1xf32>, vector<2x1xf32>, vector<2x1xf32>, vector<2x1xf32>, vector<2x1xf32>, vector<2x1xf32>, vector<2x1xf32>, vector<2x1xf32> -> vector<2x8xf32>
    %337 = arith.negf %336 : vector<2x8xf32>
    %338 = math.exp %337 : vector<2x8xf32>
    %cst_39 = arith.constant 1.000000e+00 : f32
    %339 = vector.broadcast %cst_39 : f32 to vector<2x8xf32>
    %340 = arith.addf %339, %338 : vector<2x8xf32>
    %341 = arith.divf %339, %340 : vector<2x8xf32>
    %cst_40 = arith.constant 5.000000e+00 : f32
    %342 = vector.broadcast %cst_40 : f32 to vector<2x8xf32>
    %343 = arith.mulf %341, %342 : vector<2x8xf32>
    %c0_41 = arith.constant 0 : index
    %c0_42 = arith.constant 0 : index
    %344 = vector.load %arg4[%c0_41, %c0_42] : memref<2x8xf32, #tpu.memory_space<vmem>>, vector<2x8xf32>
    tpu.vector_store %arg4[%c0_41, %c0_42], %343 {strides = array<i32>} : memref<2x8xf32, #tpu.memory_space<vmem>>, vector<2x8xf32>,
    %345 = tpu.concatenate %55, %95, %135, %175, %215, %255, %295, %335 in 1 : vector<2x1xf32>, vector<2x1xf32>, vector<2x1xf32>, vector<2x1xf32>, vector<2x1xf32>, vector<2x1xf32>, vector<2x1xf32>, vector<2x1xf32> -> vector<2x8xf32>
    %346 = arith.negf %345 : vector<2x8xf32>
    %347 = math.exp %346 : vector<2x8xf32>
    %cst_43 = arith.constant 1.000000e+00 : f32
    %348 = vector.broadcast %cst_43 : f32 to vector<2x8xf32>
    %349 = arith.addf %348, %347 : vector<2x8xf32>
    %350 = arith.divf %348, %349 : vector<2x8xf32>
    %cst_44 = arith.constant 5.000000e+00 : f32
    %351 = vector.broadcast %cst_44 : f32 to vector<2x8xf32>
    %352 = arith.mulf %350, %351 : vector<2x8xf32>
    %c0_45 = arith.constant 0 : index
    %c0_46 = arith.constant 0 : index
    %353 = vector.load %arg5[%c0_45, %c0_46] : memref<2x8xf32, #tpu.memory_space<vmem>>, vector<2x8xf32>
    tpu.vector_store %arg5[%c0_45, %c0_46], %352 {strides = array<i32>} : memref<2x8xf32, #tpu.memory_space<vmem>>, vector<2x8xf32>,
    return
  }
}

</mosaic_0001>

<bundles_post_ra>
// kernel: policy_network_forward.1
= control target key start
LH: loop header
LB: loop body
LE: loop exit
PB: predicated region body
PF: predicated region fallthrough
CT: control target
= control target key end

     0   :  { %11 = vsyncpa [#allocation3], 0  ;;  %vm36_vm0 = vcmask 1043456   ;;  %v804_v1 = vmov 0.0   ;;  %vm32_vm1 = vcmask 31744   ;;  %s1033_s0 = inlined_call_operand.vmem [shape: f32[2,8,4], index: 0, kind: input, shape index: {}]   ;;  %s1034_s1 = inlined_call_operand.vmem [shape: f32[4,8], index: 1, kind: input, shape index: {}]   ;;  %s1035_s2 = inlined_call_operand.vmem [shape: f32[2,8], index: 2, kind: input, shape index: {}]   ;;  %s1036_s3 = inlined_call_operand.vmem [shape: f32[1,8], index: 3, kind: input, shape index: {}]   ;;  %s1037_s4 = inlined_call_operand.hbm [shape: f32[2,8], index: 4, kind: output, shape index: {0}]   ;;  %s1038_s5 = inlined_call_operand.hbm [shape: f32[2,8], index: 5, kind: output, shape index: {1}]  }
   0x1   :  { %v21_v0 = vld [vmem:[%s1034_s1] sm:$0xf]  ;;  %649 = vmatprep.subr.mxu0 %v804_v1  ;;  %654 = vmatprep.subr.mxu1 %v804_v1  ;;  %v630_v3 = vld [vmem:[%s1033_s0 + $0x8] sm:$0xff] }
   0x2   :  { %v25_v2 = vld [vmem:[%s1033_s0] sm:$0xff] }
   0x3   :  { %12 = vsyncpa [#allocation5], 0  ;;  %650 = vmatpush3.msk.msra.mxu0 %vm36_vm0, %v21_v0  ;;  %vm805_vm2 = vmmov 0   ;;  %655 = vmatpush3.msk.msra.mxu1 %vm36_vm0, %v21_v0  ;;  %v627_v4 = vld [vmem:[%s1036_s3] ss:$0 sm:$0xff]  ;;  %vm188_vm3 = vcmask 1040384  }
   0x4   :  { %651 = vmatprep.mubr.msk.f32.mxu0 %vm805_vm2, %v804_v1  ;;  %656 = vmatprep.mubr.msk.f32.mxu1 %vm805_vm2, %v804_v1  ;;  %v867_v5 = vld [vmem:[%s1035_s2] ss:$0 sm:$0xff]  ;;  %v872_v6 = vld [vmem:[%s1035_s2 + $0x1] ss:$0 sm:$0xff]  ;;  %s806_s2 = smov 124   ;;  %s807_s3 = smov 2  }
   0x5   :  { %652 = vmatmul.mubr.msk.f32.vlgmr.msra.gmra.mrb[0].mxu0 %vm32_vm1, %v25_v2  ;;  %657 = vmatmul.mubr.msk.f32.vlgmr.msra.gmra.mrb[0].mxu1 %vm32_vm1, %v630_v3  ;;  %v194_v13 = vmul.f32 0.0, %v867_v5  ;;  %v200_v14 = vmul.f32 0.0, %v872_v6  ;;  %v808_v49 = vmov 7   ;;  %v809_v50 = vmov 6   ;;  %s810_s28 = smov 4   ;;  %s811_s29 = smov 122  }
   0x6   :  { %676 = vset.pattern.permute.xlu0 %v808_v49  ;;  %675 = vset.pattern.permute.xlu1 %v809_v50  ;;  %s812_s30 = smov 121   ;;  %s813_s6 = smov 125   ;;  %vm541_vm4 = vcmask 7168   ;;  %vm543_vm5 = vcmask 15360   ;;  %vm545_vm6 = vcmask 23552   ;;  %vm548_vm7 = vcmask 39936  }
   0x7   :  { %s814_s7 = smov 126   ;;  %s815_s8 = smov 127   ;;  %vm550_vm8 = vcmask 48128   ;;  %vm552_vm9 = vcmask 56320   ;;  %vm561_vm10 = vcmask 58368  }
   0x8   :  { %s816_s9 = smov 123   ;;  %s817_s10 = smov 1  }
   0x9   :  { %s818_s11 = smov [#allocation4]  }
   0xa   :  { %s615_s12 = sshll.u32 %s818_s11, 4  ;;  %s616_s12 = int_to_ptr.vmem [resolvable:$true] %s615_s12 }
   0xb   :  { %s756_s13 = scalar_lea.vmem %s616_s12, 32  ;;  %p761_p1 = scmp.lt.s32.totalorder %s616_s12, %s616_s12 }
   0xc   :  { %p757_p0 = scmp.ne.s32.totalorder %s616_s12, %s756_s13  ;;  %p762_p2 = scmp.lt.s32.totalorder %s756_s13, %s756_s13 }
   0xe   :  { %p763_p3 = por %p762_p2, %p761_p1 }
  0x10   :  { %p764_p4 = pnand %p763_p3, %p757_p0 }
  0xd8   :  { %v106_v7 = vpop.f32.mrb[0].mxu0  ;;  %v181_v8 = vpop.f32.mrb[0].mxu1 }
  0xd9   :  { %v107_v9 = vadd.f32 %v627_v4, %v106_v7  ;;  %v182_v10 = vadd.f32 %v627_v4, %v181_v8  ;;  %v658_v11 = vpop.f32.mrb[1].mxu1  ;;  %v653_v12 = vpop.f32.mrb[1].mxu0 }
  0xdb   :  { %v186_v15 = vrot.slane %v182_v10, 7  ;;  %v227_v16 = vrot.slane %v107_v9, 1  ;;  %v267_v17 = vrot.slane %v107_v9, 2  ;;  %v269_v18 = vrot.slane %v182_v10, 1 }
  0xdc   :  { %v309_v19 = vrot.slane %v107_v9, 3  ;;  %v311_v20 = vrot.slane %v182_v10, 2  ;;  %v351_v21 = vrot.slane %v107_v9, 4  ;;  %v353_v22 = vrot.slane %v182_v10, 3 }
  0xdd   :  { %v189_v23 = vsel %vm188_vm3, %v107_v9, %v186_v15  ;;  %v229_v24 = vsel %vm188_vm3, %v227_v16, %v182_v10  ;;  %v879_v25 = vsel %vm188_vm3, %v267_v17, %v269_v18  ;;  %v393_v26 = vrot.slane %v107_v9, 5 }
  0xde   :  { %v195_v27 = vadd.f32 %v194_v13, %v189_v23  ;;  %v882_v28 = vsel %vm188_vm3, %v309_v19, %v311_v20  ;;  %v885_v29 = vsel %vm188_vm3, %v351_v21, %v353_v22  ;;  %v395_v30 = vrot.slane %v182_v10, 4 }
  0xdf   :  { %v435_v31 = vrot.slane %v107_v9, 6  ;;  %v437_v32 = vrot.slane %v182_v10, 5  ;;  %v477_v33 = vrot.slane %v107_v9, 7  ;;  %v479_v34 = vrot.slane %v182_v10, 6 }
  0xe0   :  { %v201_v35 = vadd.f32 %v200_v14, %v195_v27  ;;  %v888_v36 = vsel %vm188_vm3, %v393_v26, %v395_v30 }
  0xe1   :  { %v891_v37 = vsel %vm188_vm3, %v435_v31, %v437_v32  ;;  %v894_v38 = vsel %vm188_vm3, %v477_v33, %v479_v34 }
  0xe2   :  { %684 = vtanh.f32 %v201_v35  ;;  %v635_v40 = vmul.f32 -1.442695, %v201_v35 }
  0xe4   :  { %686 = vpow2.f32 %v635_v40 }
  0xec   :  { %v685_v39 = vpop.eup %684 }
  0xed   :  { %211 = vrot.lane.b32.xlu0 %v685_v39, %s806_s2 }
  0xee   :  { %v687_v41 = vpop.eup %686 }
  0xef   :  { %v205_v42 = vadd.f32 1.0, %v687_v41 }
  0xf1   :  { %688 = vrcp.f32 %v205_v42 }
  0xfb   :  { %v689_v43 = vpop.eup %688 }
  0xfc   :  { %v209_v46 = vmul.f32 0.0, %v689_v43 }
 0x15f   :  { %v212_v44 = vpop.permute.xlu0 %211 }
 0x160   :  { %v214_v45 = vmul.f32 %v689_v43, %v212_v44 }
 0x162   :  { %216 = vrot.lane.b32.xlu0 %v214_v45, %s807_s3 }
 0x1d4   :  { %v217_v47 = vpop.permute.xlu0 %216 }
 0x1d5   :  { %v219_v48 = vadd.f32 %v217_v47, %v209_v46 }
 0x1d7   :  { %690 = vtanh.f32 %v219_v48 }
 0x1e1   :  { %v691_v51 = vpop.eup %690 }
 0x1e2   :  { %222 = vrot.lane.b32.xlu1 %v691_v51, %s810_s28 }
 0x254   :  { %v223_v52 = vpop.permute.xlu1 %222 }
 0x255   :  { %v901_v53 = vmul.f32 %v689_v43, %v223_v52 }
 0x257   :  { %238 = vperm.xlu0 %676, %v901_v53   ;;  %232 = vperm.xlu1 %675, %v901_v53  }
 0x2d6   :  { %v239_v54 = vpop.permute.xlu0 %238  ;;  %v233_v55 = vpop.permute.xlu1 %232 }
 0x2d7   :  { %v235_v56 = vmul.f32 %v867_v5, %v233_v55  ;;  %v241_v57 = vmul.f32 %v872_v6, %v239_v54 }
 0x2d9   :  { %v236_v58 = vadd.f32 %v235_v56, %v229_v24 }
 0x2db   :  { %v242_v59 = vadd.f32 %v241_v57, %v236_v58 }
 0x2dd   :  { %692 = vtanh.f32 %v242_v59  ;;  %v636_v61 = vmul.f32 -1.442695, %v242_v59 }
 0x2df   :  { %694 = vpow2.f32 %v636_v61 }
 0x2e7   :  { %v693_v60 = vpop.eup %692 }
 0x2e8   :  { %252 = vrot.lane.b32.xlu1 %v693_v60, %s806_s2 }
 0x2e9   :  { %v695_v62 = vpop.eup %694 }
 0x2ea   :  { %v246_v63 = vadd.f32 1.0, %v695_v62 }
 0x2ec   :  { %696 = vrcp.f32 %v246_v63 }
 0x2f6   :  { %v697_v0 = vpop.eup %696 }
 0x2f7   :  { %v250_v3 = vmul.f32 %v697_v0, %v219_v48 }
 0x35a   :  { %v253_v1 = vpop.permute.xlu1 %252 }
 0x35b   :  { %v255_v2 = vmul.f32 %v697_v0, %v253_v1 }
 0x35d   :  { %257 = vrot.lane.b32.xlu1 %v255_v2, %s807_s3 }
 0x3cf   :  { %v258_v4 = vpop.permute.xlu1 %257 }
 0x3d0   :  { %v260_v7 = vadd.f32 %v258_v4, %v250_v3 }
 0x3d2   :  { %698 = vtanh.f32 %v260_v7 }
 0x3dc   :  { %v699_v8 = vpop.eup %698 }
 0x3dd   :  { %263 = vrot.lane.b32.xlu0 %v699_v8, %s810_s28 }
 0x44f   :  { %v264_v9 = vpop.permute.xlu0 %263 }
 0x450   :  { %v910_v10 = vmul.f32 %v697_v0, %v264_v9 }
 0x452   :  { %280 = vperm.xlu0 %676, %v910_v10   ;;  %274 = vperm.xlu1 %675, %v910_v10  }
 0x456   :  { %677 = vset.pattern.permute.xlu0 %v809_v50  ;;  %678 = vset.pattern.permute.xlu1 %v808_v49 }
 0x4d1   :  { %v281_v11 = vpop.permute.xlu0 %280  ;;  %v275_v12 = vpop.permute.xlu1 %274 }
 0x4d2   :  { %v277_v13 = vmul.f32 %v867_v5, %v275_v12  ;;  %v283_v14 = vmul.f32 %v872_v6, %v281_v11 }
 0x4d4   :  { %v278_v15 = vadd.f32 %v277_v13, %v879_v25 }
 0x4d6   :  { %v284_v16 = vadd.f32 %v283_v14, %v278_v15 }
 0x4d8   :  { %700 = vtanh.f32 %v284_v16  ;;  %v637_v18 = vmul.f32 -1.442695, %v284_v16 }
 0x4da   :  { %702 = vpow2.f32 %v637_v18 }
 0x4e2   :  { %v701_v17 = vpop.eup %700 }
 0x4e3   :  { %294 = vrot.lane.b32.xlu1 %v701_v17, %s806_s2 }
 0x4e4   :  { %v703_v19 = vpop.eup %702 }
 0x4e5   :  { %v288_v20 = vadd.f32 1.0, %v703_v19 }
 0x4e7   :  { %704 = vrcp.f32 %v288_v20 }
 0x4f1   :  { %v705_v21 = vpop.eup %704 }
 0x4f2   :  { %v292_v24 = vmul.f32 %v705_v21, %v260_v7 }
 0x555   :  { %v295_v22 = vpop.permute.xlu1 %294 }
 0x556   :  { %v297_v23 = vmul.f32 %v705_v21, %v295_v22 }
 0x558   :  { %299 = vrot.lane.b32.xlu0 %v297_v23, %s807_s3 }
 0x5ca   :  { %v300_v26 = vpop.permute.xlu0 %299 }
 0x5cb   :  { %v302_v27 = vadd.f32 %v300_v26, %v292_v24 }
 0x5cd   :  { %706 = vtanh.f32 %v302_v27 }
 0x5d7   :  { %v707_v25 = vpop.eup %706 }
 0x5d8   :  { %305 = vrot.lane.b32.xlu1 %v707_v25, %s810_s28 }
 0x64a   :  { %v306_v30 = vpop.permute.xlu1 %305 }
 0x64b   :  { %v922_v31 = vmul.f32 %v705_v21, %v306_v30 }
 0x64d   :  { %322 = vperm.xlu1 %678, %v922_v31   ;;  %316 = vperm.xlu0 %677, %v922_v31  }
 0x6cc   :  { %v323_v32 = vpop.permute.xlu1 %322  ;;  %v317_v33 = vpop.permute.xlu0 %316 }
 0x6cd   :  { %v319_v34 = vmul.f32 %v867_v5, %v317_v33  ;;  %v325_v35 = vmul.f32 %v872_v6, %v323_v32 }
 0x6cf   :  { %v320_v39 = vadd.f32 %v319_v34, %v882_v28 }
 0x6d1   :  { %v326_v40 = vadd.f32 %v325_v35, %v320_v39 }
 0x6d3   :  { %708 = vtanh.f32 %v326_v40  ;;  %v638_v42 = vmul.f32 -1.442695, %v326_v40 }
 0x6d5   :  { %710 = vpow2.f32 %v638_v42 }
 0x6dd   :  { %v709_v41 = vpop.eup %708 }
 0x6de   :  { %336 = vrot.lane.b32.xlu1 %v709_v41, %s806_s2 }
 0x6df   :  { %v711_v43 = vpop.eup %710 }
 0x6e0   :  { %v330_v44 = vadd.f32 1.0, %v711_v43 }
 0x6e2   :  { %712 = vrcp.f32 %v330_v44 }
 0x6ec   :  { %v713_v45 = vpop.eup %712 }
 0x6ed   :  { %v334_v48 = vmul.f32 %v713_v45, %v302_v27 }
 0x750   :  { %v337_v46 = vpop.permute.xlu1 %336 }
 0x751   :  { %v339_v47 = vmul.f32 %v713_v45, %v337_v46 }
 0x753   :  { %341 = vrot.lane.b32.xlu0 %v339_v47, %s807_s3 }
 0x7c5   :  { %v342_v51 = vpop.permute.xlu0 %341 }
 0x7c6   :  { %v344_v52 = vadd.f32 %v342_v51, %v334_v48 }
 0x7c8   :  { %714 = vtanh.f32 %v344_v52 }
 0x7d2   :  { %v715_v28 = vpop.eup %714 }
 0x7d3   :  { %347 = vrot.lane.b32.xlu1 %v715_v28, %s810_s28 }
 0x845   :  { %v348_v54 = vpop.permute.xlu1 %347 }
 0x846   :  { %v932_v55 = vmul.f32 %v713_v45, %v348_v54 }
 0x848   :  { %364 = vperm.xlu1 %678, %v932_v55   ;;  %358 = vperm.xlu0 %677, %v932_v55  }
 0x84c   :  { %679 = vset.pattern.permute.xlu1 %v809_v50  ;;  %680 = vset.pattern.permute.xlu0 %v808_v49 }
 0x8c7   :  { %v365_v56 = vpop.permute.xlu1 %364  ;;  %v359_v57 = vpop.permute.xlu0 %358 }
 0x8c8   :  { %v361_v58 = vmul.f32 %v867_v5, %v359_v57  ;;  %v367_v59 = vmul.f32 %v872_v6, %v365_v56 }
 0x8ca   :  { %v362_v60 = vadd.f32 %v361_v58, %v885_v29 }
 0x8cc   :  { %v368_v61 = vadd.f32 %v367_v59, %v362_v60 }
 0x8ce   :  { %716 = vtanh.f32 %v368_v61  ;;  %v639_v63 = vmul.f32 -1.442695, %v368_v61 }
 0x8d0   :  { %718 = vpow2.f32 %v639_v63 }
 0x8d8   :  { %v717_v62 = vpop.eup %716 }
 0x8d9   :  { %378 = vrot.lane.b32.xlu0 %v717_v62, %s806_s2 }
 0x8da   :  { %v719_v0 = vpop.eup %718 }
 0x8db   :  { %v372_v1 = vadd.f32 1.0, %v719_v0 }
 0x8dd   :  { %720 = vrcp.f32 %v372_v1 }
 0x8e7   :  { %v721_v2 = vpop.eup %720 }
 0x8e8   :  { %v376_v7 = vmul.f32 %v721_v2, %v344_v52 }
 0x94b   :  { %v379_v3 = vpop.permute.xlu0 %378 }
 0x94c   :  { %v381_v4 = vmul.f32 %v721_v2, %v379_v3 }
 0x94e   :  { %383 = vrot.lane.b32.xlu1 %v381_v4, %s807_s3 }
 0x9c0   :  { %v384_v8 = vpop.permute.xlu1 %383 }
 0x9c1   :  { %v386_v9 = vadd.f32 %v384_v8, %v376_v7 }
 0x9c3   :  { %722 = vtanh.f32 %v386_v9 }
 0x9cd   :  { %v723_v29 = vpop.eup %722 }
 0x9ce   :  { %389 = vrot.lane.b32.xlu0 %v723_v29, %s810_s28 }
 0xa40   :  { %v390_v11 = vpop.permute.xlu0 %389 }
 0xa41   :  { %v944_v12 = vmul.f32 %v721_v2, %v390_v11 }
 0xa43   :  { %406 = vperm.xlu0 %680, %v944_v12   ;;  %400 = vperm.xlu1 %679, %v944_v12  }
 0xac2   :  { %v407_v13 = vpop.permute.xlu0 %406  ;;  %v401_v14 = vpop.permute.xlu1 %400 }
 0xac3   :  { %v403_v15 = vmul.f32 %v867_v5, %v401_v14  ;;  %v409_v16 = vmul.f32 %v872_v6, %v407_v13 }
 0xac5   :  { %v404_v17 = vadd.f32 %v403_v15, %v888_v36 }
 0xac7   :  { %v410_v18 = vadd.f32 %v409_v16, %v404_v17 }
 0xac9   :  { %724 = vtanh.f32 %v410_v18  ;;  %v640_v20 = vmul.f32 -1.442695, %v410_v18 }
 0xacb   :  { %726 = vpow2.f32 %v640_v20 }
 0xad3   :  { %v725_v19 = vpop.eup %724 }
 0xad4   :  { %420 = vrot.lane.b32.xlu1 %v725_v19, %s806_s2 }
 0xad5   :  { %v727_v21 = vpop.eup %726 }
 0xad6   :  { %v414_v22 = vadd.f32 1.0, %v727_v21 }
 0xad8   :  { %728 = vrcp.f32 %v414_v22 }
 0xae2   :  { %v729_v23 = vpop.eup %728 }
 0xae3   :  { %v418_v27 = vmul.f32 %v729_v23, %v386_v9 }
 0xb46   :  { %v421_v24 = vpop.permute.xlu1 %420 }
 0xb47   :  { %v423_v26 = vmul.f32 %v729_v23, %v421_v24 }
 0xb49   :  { %425 = vrot.lane.b32.xlu1 %v423_v26, %s807_s3 }
 0xbbb   :  { %v426_v25 = vpop.permute.xlu1 %425 }
 0xbbc   :  { %v428_v30 = vadd.f32 %v426_v25, %v418_v27 }
 0xbbe   :  { %730 = vtanh.f32 %v428_v30 }
 0xbc8   :  { %v731_v36 = vpop.eup %730 }
 0xbc9   :  { %431 = vrot.lane.b32.xlu0 %v731_v36, %s810_s28 }
 0xc3b   :  { %v432_v32 = vpop.permute.xlu0 %431 }
 0xc3c   :  { %v954_v33 = vmul.f32 %v729_v23, %v432_v32 }
 0xc3e   :  { %448 = vperm.xlu0 %680, %v954_v33   ;;  %442 = vperm.xlu1 %679, %v954_v33  }
 0xc42   :  { %681 = vset.pattern.permute.xlu0 %v809_v50  ;;  %682 = vset.pattern.permute.xlu1 %v808_v49 }
 0xcbd   :  { %v449_v34 = vpop.permute.xlu0 %448  ;;  %v443_v35 = vpop.permute.xlu1 %442 }
 0xcbe   :  { %v445_v39 = vmul.f32 %v867_v5, %v443_v35  ;;  %v451_v40 = vmul.f32 %v872_v6, %v449_v34 }
 0xcc0   :  { %v446_v41 = vadd.f32 %v445_v39, %v891_v37 }
 0xcc2   :  { %v452_v42 = vadd.f32 %v451_v40, %v446_v41 }
 0xcc4   :  { %732 = vtanh.f32 %v452_v42  ;;  %v641_v44 = vmul.f32 -1.442695, %v452_v42 }
 0xcc6   :  { %734 = vpow2.f32 %v641_v44 }
 0xcce   :  { %v733_v43 = vpop.eup %732 }
 0xccf   :  { %462 = vrot.lane.b32.xlu1 %v733_v43, %s806_s2 }
 0xcd0   :  { %v735_v45 = vpop.eup %734 }
 0xcd1   :  { %v456_v46 = vadd.f32 1.0, %v735_v45 }
 0xcd3   :  { %736 = vrcp.f32 %v456_v46 }
 0xcdd   :  { %v737_v50 = vpop.eup %736 }
 0xcde   :  { %v460_v51 = vmul.f32 %v737_v50, %v428_v30 }
 0xd41   :  { %v463_v47 = vpop.permute.xlu1 %462 }
 0xd42   :  { %v465_v48 = vmul.f32 %v737_v50, %v463_v47 }
 0xd44   :  { %467 = vrot.lane.b32.xlu0 %v465_v48, %s807_s3 }
 0xdb6   :  { %v468_v52 = vpop.permute.xlu0 %467 }
 0xdb7   :  { %v470_v28 = vadd.f32 %v468_v52, %v460_v51 }
 0xdb9   :  { %738 = vtanh.f32 %v470_v28 }
 0xdc3   :  { %v739_v37 = vpop.eup %738 }
 0xdc4   :  { %473 = vrot.lane.b32.xlu1 %v739_v37, %s810_s28 }
 0xe36   :  { %v474_v54 = vpop.permute.xlu1 %473 }
 0xe37   :  { %v966_v56 = vmul.f32 %v737_v50, %v474_v54 }
 0xe39   :  { %490 = vperm.xlu1 %682, %v966_v56   ;;  %484 = vperm.xlu0 %681, %v966_v56  }
 0xe3d   :  { %683 = vset.pattern.permute.xlu0 %v808_v49 }
 0xeb8   :  { %v491_v57 = vpop.permute.xlu1 %490  ;;  %v485_v58 = vpop.permute.xlu0 %484 }
 0xeb9   :  { %v487_v59 = vmul.f32 %v867_v5, %v485_v58  ;;  %v493_v60 = vmul.f32 %v872_v6, %v491_v57 }
 0xebb   :  { %v488_v61 = vadd.f32 %v487_v59, %v894_v38 }
 0xebd   :  { %v494_v62 = vadd.f32 %v493_v60, %v488_v61 }
 0xebf   :  { %740 = vtanh.f32 %v494_v62  ;;  %v642_v0 = vmul.f32 -1.442695, %v494_v62 }
 0xec1   :  { %742 = vpow2.f32 %v642_v0 }
 0xec9   :  { %v741_v63 = vpop.eup %740 }
 0xeca   :  { %504 = vrot.lane.b32.xlu1 %v741_v63, %s806_s2 }
 0xecb   :  { %v743_v1 = vpop.eup %742 }
 0xecc   :  { %v498_v2 = vadd.f32 1.0, %v743_v1 }
 0xece   :  { %744 = vrcp.f32 %v498_v2 }
 0xed8   :  { %v745_v3 = vpop.eup %744 }
 0xed9   :  { %v502_v5 = vmul.f32 %v745_v3, %v470_v28 }
 0xf3c   :  { %v505_v49 = vpop.permute.xlu1 %504 }
 0xf3d   :  { %v507_v4 = vmul.f32 %v745_v3, %v505_v49 }
 0xf3f   :  { %509 = vrot.lane.b32.xlu0 %v507_v4, %s807_s3 }
 0xf43   :  { %519 = vrot.lane.b32.xlu0 %v901_v53, %s811_s29 }
 0xf47   :  { %563 = vrot.lane.b32.xlu0 %v901_v53, %s812_s30 }
 0xf4b   :  { %525 = vrot.lane.b32.xlu0 %v922_v31, %s806_s2 }
 0xf4f   :  { %528 = vrot.lane.b32.xlu0 %v932_v55, %s813_s6 }
 0xf53   :  { %531 = vrot.lane.b32.xlu0 %v944_v12, %s814_s7 }
 0xf57   :  { %534 = vrot.lane.b32.xlu0 %v954_v33, %s815_s8 }
 0xf5b   :  { %581 = vrot.lane.b32.xlu0 %v966_v56, %s815_s8 }
 0xfb1   :  { %v510_v6 = vpop.permute.xlu0 %509 }
 0xfb2   :  { %v512_v38 = vadd.f32 %v510_v6, %v502_v5 }
 0xfb4   :  { %746 = vtanh.f32 %v512_v38 }
 0xfb5   :  { %v520_v53 = vpop.permute.xlu0 %519 }
 0xfb9   :  { %v564_v8 = vpop.permute.xlu0 %563 }
 0xfbd   :  { %v526_v9 = vpop.permute.xlu0 %525 }
 0xfbe   :  { %v747_v7 = vpop.eup %746 }
 0xfbf   :  { %515 = vrot.lane.b32.xlu1 %v747_v7, %s810_s28 }
 0xfc1   :  { %v529_v29 = vpop.permute.xlu0 %528 }
 0xfc3   :  { %522 = vrot.lane.b32.xlu1 %v910_v10, %s816_s9 }
 0xfc5   :  { %v532_v14 = vpop.permute.xlu0 %531 }
 0xfc7   :  { %566 = vrot.lane.b32.xlu1 %v910_v10, %s811_s29 }
 0xfc9   :  { %v535_v15 = vpop.permute.xlu0 %534 }
 0xfcb   :  { %569 = vrot.lane.b32.xlu1 %v922_v31, %s816_s9 }
 0xfcd   :  { %v582_v30 = vpop.permute.xlu0 %581 }
 0xfcf   :  { %572 = vrot.lane.b32.xlu1 %v932_v55, %s806_s2 }
 0xfd3   :  { %575 = vrot.lane.b32.xlu1 %v944_v12, %s813_s6 }
 0xfd7   :  { %578 = vrot.lane.b32.xlu1 %v954_v33, %s814_s7 }
0x1031   :  { %v516_v11 = vpop.permute.xlu1 %515 }
0x1032   :  { %v518_v13 = vmul.f32 %v745_v3, %v516_v11 }
0x1034   :  { %538 = vrot.lane.b32.xlu1 %v518_v13, %s817_s10 }
0x1035   :  { %v523_v10 = vpop.permute.xlu1 %522 }
0x1036   :  { %v542_v31 = vsel %vm541_vm4, %v520_v53, %v523_v10 }
0x1037   :  { %v544_v55 = vsel %vm543_vm5, %v542_v31, %v526_v9 }
0x1038   :  { %v546_v12 = vsel %vm545_vm6, %v544_v55, %v529_v29 }
0x1039   :  { %v567_v16 = vpop.permute.xlu1 %566  ;;  %v547_v17 = vsel %vm32_vm1, %v546_v12, %v532_v14 }
0x103a   :  { %v549_v18 = vsel %vm548_vm7, %v547_v17, %v535_v15  ;;  %v584_v23 = vsel %vm541_vm4, %v564_v8, %v567_v16 }
0x103b   :  { %v551_v19 = vsel %vm550_vm8, %v549_v18, %v966_v56 }
0x103d   :  { %v570_v20 = vpop.permute.xlu1 %569 }
0x103e   :  { %v585_v24 = vsel %vm543_vm5, %v584_v23, %v570_v20 }
0x1041   :  { %v573_v21 = vpop.permute.xlu1 %572 }
0x1042   :  { %v586_v26 = vsel %vm545_vm6, %v585_v24, %v573_v21 }
0x1045   :  { %v576_v22 = vpop.permute.xlu1 %575 }
0x1046   :  { %v587_v27 = vsel %vm32_vm1, %v586_v26, %v576_v22 }
0x1049   :  { %v579_v25 = vpop.permute.xlu1 %578 }
0x104a   :  { %v588_v36 = vsel %vm548_vm7, %v587_v27, %v579_v25 }
0x104b   :  { %v589_v32 = vsel %vm550_vm8, %v588_v36, %v582_v30 }
0x104c   :  { %v590_v33 = vsel %vm552_vm9, %v589_v32, %v518_v13 }
0x104d   :  { %v644_v34 = vmul.f32 -1.442695, %v590_v33 }
0x104f   :  { %748 = vpow2.f32 %v644_v34 }
0x1059   :  { %v749_v35 = vpop.eup %748 }
0x105a   :  { %v594_v39 = vadd.f32 1.0, %v749_v35 }
0x105c   :  { %750 = vrcp.f32 %v594_v39 }
0x1066   :  { %v751_v40 = vpop.eup %750 }
0x1067   :  { %v597_v41 = vmul.f32 5.0, %v751_v40 }
0x1069   :  { %598 = vst.msk [vmem:[#allocation4] sm:$0x3] %vm561_vm10, %v597_v41 }
0x106a   :  { %767 = shalt.err (!%p764_p4)
}
0x106b   :  { %s768_s16 = scalar_lea.hbm %s1038_s5, 32 }
0x106c   :  { %p769_p5 = scmp.ne.s32.totalorder %s1038_s5, %s768_s16  ;;  %p772_p6 = scmp.lt.u32.totalorder %s768_s16, %s1038_s5 }
0x106e   :  { %p774_p7 = pnand %p772_p6, %p769_p5 }
0x1070   :  { %777 = shalt.err (!%p774_p7)
}
0x1071   :  { %618 = dma.vmem_to_hbm [thread:$0]  %s616_s12, 32, %s1038_s5, [#allocation5]  }
0x1072   :  { %s819_s23 = smov [#allocation2]  }
0x1073   :  { %s605_s1 = sshll.u32 %s819_s23, 4  ;;  %s606_s1 = int_to_ptr.vmem [resolvable:$true] %s605_s1 }
0x1074   :  { %s778_s24 = scalar_lea.vmem %s606_s1, 32  ;;  %p783_p9 = scmp.lt.s32.totalorder %s606_s1, %s606_s1 }
0x1075   :  { %p779_p8 = scmp.ne.s32.totalorder %s606_s1, %s778_s24  ;;  %p784_p10 = scmp.lt.s32.totalorder %s778_s24, %s778_s24 }
0x1077   :  { %p785_p11 = por %p784_p10, %p783_p9 }
0x1079   :  { %p786_p12 = pnand %p785_p11, %p779_p8 }
0x10a6   :  { %v539_v42 = vpop.permute.xlu1 %538 }
0x10a7   :  { %v553_v43 = vsel %vm552_vm9, %v551_v19, %v539_v42 }
0x10a8   :  { %v643_v44 = vmul.f32 -1.442695, %v553_v43 }
0x10aa   :  { %752 = vpow2.f32 %v643_v44 }
0x10b4   :  { %v753_v45 = vpop.eup %752 }
0x10b5   :  { %v557_v46 = vadd.f32 1.0, %v753_v45 }
0x10b7   :  { %754 = vrcp.f32 %v557_v46 }
0x10c1   :  { %v755_v50 = vpop.eup %754 }
0x10c2   :  { %v560_v47 = vmul.f32 5.0, %v755_v50 }
0x10c4   :  { %562 = vst.msk [vmem:[#allocation2] sm:$0x3] %vm561_vm10, %v560_v47 }
0x10c5   :  { %789 = shalt.err (!%p786_p12)
}
0x10c6   :  { %s790_s26 = scalar_lea.hbm %s1037_s4, 32 }
0x10c7   :  { %p791_p13 = scmp.ne.s32.totalorder %s1037_s4, %s790_s26  ;;  %p794_p0 = scmp.lt.u32.totalorder %s790_s26, %s1037_s4 }
0x10c9   :  { %p796_p1 = pnand %p794_p0, %p791_p13 }
0x10cb   :  { %799 = shalt.err (!%p796_p1)
}
0x10cc   :  { %608 = dma.vmem_to_hbm [thread:$0]  %s606_s1, 32, %s1037_s4, [#allocation3]  }
0x10cd   :  { %800 = dma.done.wait [#allocation3], 32  }
0x10ce   :  { %801 = vsyncadd [#allocation3], 4294967264 }
0x10cf   :  { %802 = dma.done.wait [#allocation5], 32  }
0x10d0   :  { %803 = vsyncadd [#allocation5], 4294967264 }
0x10d1   :  { %625 = vsyncpa [#allocation3], 1 }
0x10d2   :  { %626 = vsyncpa [#allocation5], 1 }

</bundles_post_ra>
